<compile_context>
chip_gen: v6e
topology: v6e:2x2x1
jax: 0.10.0
libtpu: 0.0.40
codegen_flags: <defaults>
</compile_context>

<pallas_src>
import jax
import jax.numpy as jnp
from jax.experimental import pallas as pl
from jax.experimental.pallas import tpu as pltpu


def _round_up(n, m):
    return ((n + m - 1) // m) * m


def _mlp_kernel(x_ref, w1_ref, b1_ref, w2_ref, b2_ref, o_ref):
    # layer 1: x @ W1 on the MXU (f32 accumulate), bias + ReLU in f32 on the VPU.
    h = jnp.dot(x_ref[...], w1_ref[...], preferred_element_type=jnp.float32)
    h = jnp.maximum(h + b1_ref[...], 0.0)
    # Dropout: eval-mode identity (PyTorch nn.Dropout is a no-op in eval()).
    # TODO(synk): training-mode dropout would need pltpu.prng_seed/prng_random_bits masking.
    # layer 2: cast activations back to the matmul input dtype (bf16 fast path on v6e/v7x),
    # f32 accumulate, f32 bias add, lane-dense store (out_p is a multiple of 128).
    h = h.astype(w2_ref.dtype)
    out = jnp.dot(h, w2_ref[...], preferred_element_type=jnp.float32) + b2_ref[...]
    o_ref[...] = out.astype(o_ref.dtype)


def prepare_params(params, compute_dtype=jnp.float32):
    """One-time parameter setup (NOT on the per-call forward path).

    weight_norm(dim=None): W_eff = g * V / ||V||_F with a single scalar g per layer.
    Effective weights are transposed to (in, hid) / (hid, out), zero-padded so hid/out are
    multiples of 128 (lane-dense output + full MXU width) and cast to compute_dtype.
    Biases stay f32 (added on the f32 accumulator).
    """
    v1, g1, b1 = params["v1"], params["g1"], params["b1"]
    v2, g2, b2 = params["v2"], params["g2"], params["b2"]
    w1 = (g1 / jnp.linalg.norm(v1)) * v1          # (hid, in)
    w2 = (g2 / jnp.linalg.norm(v2)) * v2          # (out, hid)

    hid_dim, in_dim = v1.shape
    out_dim = v2.shape[0]
    hid_p = _round_up(hid_dim, 128)
    out_p = _round_up(out_dim, 128)

    w1_t = jnp.zeros((in_dim, hid_p), jnp.float32).at[:, :hid_dim].set(w1.T)
    b1_p = jnp.zeros((1, hid_p), jnp.float32).at[:, :hid_dim].set(b1[None, :])
    w2_t = jnp.zeros((hid_p, out_p), jnp.float32).at[:hid_dim, :out_dim].set(w2.T)
    b2_p = jnp.zeros((1, out_p), jnp.float32).at[:, :out_dim].set(b2[None, :])

    return {
        "w1": w1_t.astype(compute_dtype),
        "b1": b1_p,
        "w2": w2_t.astype(compute_dtype),
        "b2": b2_p,
        "out_dim": out_dim,   # plain Python int (not traced)
    }


def simple_classifier_forward(x, prep, *, tb=None):
    """x: (B, in_dim). prep: output of prepare_params(). Returns (B, out_dim) f32 logits."""
    B, in_dim = x.shape
    hid_p = prep["w1"].shape[1]
    out_p = prep["w2"].shape[1]
    out_dim = prep["out_dim"]

    # bf16 fast path on v6e/v7x (ideally upstream already produces bf16 activations).
    x = x.astype(prep["w1"].dtype)

    # Batch tile: as large as comfortably fits VMEM; sublane rule = multiple of 8 or full dim.
    if tb is None:
        tb = min(512, B)
    tb = min(tb, B)
    if B % 8 != 0:
        tb = B
    grid = (pl.cdiv(B, tb),)

    itemsize = x.dtype.itemsize
    bytes_accessed = (
        B * in_dim * itemsize
        + in_dim * hid_p * itemsize
        + hid_p * out_p * itemsize
        + (hid_p + out_p) * 4
        + B * out_p * 4
    )
    cost = pl.CostEstimate(
        flops=2 * B * in_dim * hid_p + 2 * B * hid_p * out_p,
        transcendentals=0,
        bytes_accessed=bytes_accessed,
    )

    out_padded = pl.pallas_call(
        _mlp_kernel,
        out_shape=jax.ShapeDtypeStruct((B, out_p), jnp.float32),
        grid=grid,
        in_specs=[
            pl.BlockSpec((tb, in_dim), lambda i: (i, 0)),      # x: tiled over batch
            pl.BlockSpec((in_dim, hid_p), lambda i: (0, 0)),   # weights/biases: VMEM-resident
            pl.BlockSpec((1, hid_p), lambda i: (0, 0)),
            pl.BlockSpec((hid_p, out_p), lambda i: (0, 0)),
            pl.BlockSpec((1, out_p), lambda i: (0, 0)),
        ],
        out_specs=pl.BlockSpec((tb, out_p), lambda i: (i, 0)),  # lane-dense (out_p % 128 == 0)
        compiler_params=pltpu.CompilerParams(
            dimension_semantics=("parallel",)),  # batch axis shards across v7x's 2 TCs
        cost_estimate=cost,
    )(x, prep["w1"], prep["b1"], prep["w2"], prep["b2"])

    # Strip the lane padding back to the real number of classes.
    return out_padded[:, :out_dim]


def init_params(key, in_dim, hid_dim, out_dim):
    """Deterministic synthetic params mimicking weight_norm-wrapped nn.Linear shapes."""
    k1, k2, k3, k4 = jax.random.split(key, 4)
    v1 = jax.random.normal(k1, (hid_dim, in_dim), jnp.float32) * 0.1   # Linear1.weight_v
    b1 = jax.random.normal(k2, (hid_dim,), jnp.float32) * 0.1          # Linear1.bias
    v2 = jax.random.normal(k3, (out_dim, hid_dim), jnp.float32) * 0.1  # Linear2.weight_v
    b2 = jax.random.normal(k4, (out_dim,), jnp.float32) * 0.1          # Linear2.bias
    # weight_norm init sets g = ||V||_F so that W == V at init; keep that convention.
    g1 = jnp.linalg.norm(v1)
    g2 = jnp.linalg.norm(v2)
    return {"v1": v1, "g1": g1, "b1": b1, "v2": v2, "g2": g2, "b2": b2}


def _reference(x, params):
    w1 = params["g1"] * params["v1"] / jnp.linalg.norm(params["v1"])
    w2 = params["g2"] * params["v2"] / jnp.linalg.norm(params["v2"])
    h = jnp.maximum(x @ w1.T + params["b1"], 0.0)
    return h @ w2.T + params["b2"]


if __name__ == "__main__":
    B, in_dim, hid_dim, out_dim = 256, 32, 64, 16
    key = jax.random.PRNGKey(0)
    kx, kp = jax.random.split(key)
    x = jax.random.normal(kx, (B, in_dim), jnp.float32)
    params = init_params(kp, in_dim, hid_dim, out_dim)
    ref = _reference(x, params)

    # f32 path (exact semantics check); tb=128 -> grid=(2,), exercises batch pipelining.
    prep_f32 = prepare_params(params, compute_dtype=jnp.float32)
    out_f32 = jax.block_until_ready(simple_classifier_forward(x, prep_f32, tb=128))
    assert out_f32.shape == (B, out_dim)
    assert jnp.allclose(out_f32, ref, atol=1e-4, rtol=1e-4), "f32 mismatch vs reference"

    # bf16 matmul-input fast path (v6e/v7x MXU; f32 accumulate + f32 bias/ReLU).
    prep_bf16 = prepare_params(params, compute_dtype=jnp.bfloat16)
    out_bf16 = jax.block_until_ready(simple_classifier_forward(x, prep_bf16, tb=128))
    assert out_bf16.shape == (B, out_dim)
    assert jnp.allclose(out_bf16, ref, atol=5e-2, rtol=5e-2), "bf16 mismatch vs reference"

    print("KERNEL_OK")
</pallas_src>

<mosaic_0001>
module attributes {stable_mosaic.version = 11 : i64} {
  func.func @_mlp_kernel(%arg0: i32, %arg1: memref<128x32xf32, #tpu.memory_space<vmem>>, %arg2: memref<32x128xf32, #tpu.memory_space<vmem>>, %arg3: memref<1x128xf32, #tpu.memory_space<vmem>>, %arg4: memref<128x128xf32, #tpu.memory_space<vmem>>, %arg5: memref<1x128xf32, #tpu.memory_space<vmem>>, %arg6: memref<128x128xf32, #tpu.memory_space<vmem>>) attributes {dimension_semantics = [#tpu.dimension_semantics<parallel>], iteration_bounds = array<i64: 2>, scalar_prefetch = 0 : i64, scratch_operands = 0 : i64, tpu.core_type = #tpu.core_type<tc>, window_params = [{transform_indices = @transform_0, window_bounds = array<i64: 128, 32>}, {pipeline_mode = #tpu.pipeline_mode<synchronous>, transform_indices = @transform_1, window_bounds = array<i64: 32, 128>}, {pipeline_mode = #tpu.pipeline_mode<synchronous>, transform_indices = @transform_2, window_bounds = array<i64: 1, 128>}, {pipeline_mode = #tpu.pipeline_mode<synchronous>, transform_indices = @transform_3, window_bounds = array<i64: 128, 128>}, {pipeline_mode = #tpu.pipeline_mode<synchronous>, transform_indices = @transform_4, window_bounds = array<i64: 1, 128>}, {transform_indices = @transform_5, window_bounds = array<i64: 128, 128>}]} {
    %c0 = arith.constant 0 : index
    %c0_0 = arith.constant 0 : index
    %0 = vector.load %arg1[%c0, %c0_0] : memref<128x32xf32, #tpu.memory_space<vmem>>, vector<128x32xf32>
    %c0_1 = arith.constant 0 : index
    %c0_2 = arith.constant 0 : index
    %1 = vector.load %arg2[%c0_1, %c0_2] : memref<32x128xf32, #tpu.memory_space<vmem>>, vector<32x128xf32>
    %cst = arith.constant dense<0.000000e+00> : vector<128x128xf32>
    %2 = tpu.matmul %0, %1, %cst {dimension_numbers = #tpu.dot_dimension_numbers<[1], [0], [0], [1], [0, 0, 1, 1], [], []>} : vector<128x32xf32>, vector<32x128xf32>, vector<128x128xf32> -> vector<128x128xf32>
    %c0_3 = arith.constant 0 : index
    %c0_4 = arith.constant 0 : index
    %3 = vector.load %arg3[%c0_3, %c0_4] : memref<1x128xf32, #tpu.memory_space<vmem>>, vector<1x128xf32>
    %4 = vector.broadcast %3 : vector<1x128xf32> to vector<128x128xf32>
    %5 = arith.addf %2, %4 : vector<128x128xf32>
    %cst_5 = arith.constant 0.000000e+00 : f32
    %6 = vector.broadcast %cst_5 : f32 to vector<128x128xf32>
    %7 = arith.maximumf %5, %6 : vector<128x128xf32>
    %c0_6 = arith.constant 0 : index
    %c0_7 = arith.constant 0 : index
    %8 = vector.load %arg4[%c0_6, %c0_7] : memref<128x128xf32, #tpu.memory_space<vmem>>, vector<128x128xf32>
    %cst_8 = arith.constant dense<0.000000e+00> : vector<128x128xf32>
    %9 = tpu.matmul %7, %8, %cst_8 {dimension_numbers = #tpu.dot_dimension_numbers<[1], [0], [0], [1], [0, 0, 1, 1], [], []>} : vector<128x128xf32>, vector<128x128xf32>, vector<128x128xf32> -> vector<128x128xf32>
    %c0_9 = arith.constant 0 : index
    %c0_10 = arith.constant 0 : index
    %10 = vector.load %arg5[%c0_9, %c0_10] : memref<1x128xf32, #tpu.memory_space<vmem>>, vector<1x128xf32>
    %11 = vector.broadcast %10 : vector<1x128xf32> to vector<128x128xf32>
    %12 = arith.addf %9, %11 : vector<128x128xf32>
    %c0_11 = arith.constant 0 : index
    %c0_12 = arith.constant 0 : index
    %13 = vector.load %arg6[%c0_11, %c0_12] : memref<128x128xf32, #tpu.memory_space<vmem>>, vector<128x128xf32>
    tpu.vector_store %arg6[%c0_11, %c0_12], %12 {strides = array<i32>} : memref<128x128xf32, #tpu.memory_space<vmem>>, vector<128x128xf32>,
    return
  }
  func.func @transform_0(%arg0: i32) -> (i32, i32) {
    %c0_i32 = arith.constant 0 : i32
    %c0_i32_0 = arith.constant 0 : i32
    return %arg0, %c0_i32 : i32, i32
  }
  func.func @transform_1(%arg0: i32) -> (i32, i32) {
    %c0_i32 = arith.constant 0 : i32
    %c0_i32_0 = arith.constant 0 : i32
    %c0_i32_1 = arith.constant 0 : i32
    return %c0_i32, %c0_i32_0 : i32, i32
  }
  func.func @transform_2(%arg0: i32) -> (i32, i32) {
    %c0_i32 = arith.constant 0 : i32
    %c0_i32_0 = arith.constant 0 : i32
    %c0_i32_1 = arith.constant 0 : i32
    return %c0_i32, %c0_i32_0 : i32, i32
  }
  func.func @transform_3(%arg0: i32) -> (i32, i32) {
    %c0_i32 = arith.constant 0 : i32
    %c0_i32_0 = arith.constant 0 : i32
    %c0_i32_1 = arith.constant 0 : i32
    return %c0_i32, %c0_i32_0 : i32, i32
  }
  func.func @transform_4(%arg0: i32) -> (i32, i32) {
    %c0_i32 = arith.constant 0 : i32
    %c0_i32_0 = arith.constant 0 : i32
    %c0_i32_1 = arith.constant 0 : i32
    return %c0_i32, %c0_i32_0 : i32, i32
  }
  func.func @transform_5(%arg0: i32) -> (i32, i32) {
    %c0_i32 = arith.constant 0 : i32
    %c0_i32_0 = arith.constant 0 : i32
    return %arg0, %c0_i32 : i32, i32
  }
}

</mosaic_0001>

<bundles_post_ra>
// kernel: tpu_custom_call.1
= control target key start
LH: loop header
LB: loop body
LE: loop exit
PB: predicated region body
PF: predicated region fallthrough
CT: control target
= control target key end

     0   :  { %10 = vsyncpa [#allocation3], 0  ;;  %s1286_s0 = inlined_call_operand.vmem [shape: f32[256,32], index: 0, kind: input, shape index: {}]   ;;  %s1287_s1 = inlined_call_operand.vmem [shape: f32[32,128], index: 1, kind: input, shape index: {}]   ;;  %s1288_s2 = inlined_call_operand.vmem [shape: f32[1,128], index: 2, kind: input, shape index: {}]   ;;  %s1289_s3 = inlined_call_operand.vmem [shape: f32[128,128], index: 3, kind: input, shape index: {}]   ;;  %s1290_s4 = inlined_call_operand.vmem [shape: f32[1,128], index: 4, kind: input, shape index: {}]   ;;  %s1291_s5 = inlined_call_operand.hbm [shape: f32[256,128], index: 5, kind: output, shape index: {}]  }
   0x1   :  { %12 = vsyncpa [#allocation3 + $0x1], 0  ;;  %s1062_s18 = smov 0   ;;  %s1064_s19 = smov 0  }
   0x2   :  { %s1066_s20 = smov 0   ;;  %s1068_s21 = smov 0  }
   0x3 LB: > { %s1083_s22 = sadd.s32 4294967295, %s1027_s21   ;;  %s723_s23 = sadd.s32 4294967294, %s1027_s21   ;;  %s1027_s21 = sphi %s1068_s21, %s1297_s21   ;;  %s1023_s20 = sphi %s1066_s20, %s1296_s20   ;;  %s1019_s19 = sphi %s1064_s19, %s1295_s19   ;;  %s1015_s18 = sphi %s1062_s18, %s1294_s18  }
   0x4   : > { %s1087_s24 = sadd.s32 1, %s1027_s21   ;;  %s135_s25 = sadd.s32 1, %s1023_s20 }
   0x5   : > { %s132_s26 = ssub.s32 %s1027_s21, %s1087_s24  ;;  %p145_p0 = scmp.ne.s32.totalorder %s1023_s20, %s1019_s19 }
   0x6   : > { %p133_p1 = scmp.eq.s32.totalorder %s132_s26, 0  ;;  %p146_p2 = scmp.eq.s32.totalorder %s1083_s22, 1 }
   0x7   : > { %p151_p3 = scmp.ne.s32.totalorder %s1019_s19, %s1015_s18  ;;  %p152_p4 = scmp.eq.s32.totalorder %s723_s23, 1 }
   0x8   : > { %s1098_s27 = scalar_select %p133_p1, %s1023_s20, %s135_s25  }
   0x9   : > { %p1100_p5 = por %p146_p2, %p145_p0  ;;  %p1104_p6 = por %p152_p4, %p151_p3 }
   0xa   : > { %p726_p7 = scmp.ge.s32.totalorder %s1027_s21, 1  ;;  %p191_p8 = scmp.lt.s32.totalorder %s1027_s21, 3 }
   0xc   : > { %p192_p9 = pnand %p726_p7, %p191_p8 }
   0xd   : > { %s728_s9 = sshll.u32 (!%p192_p9), %s1083_s22, 4  ;;  %s216_s26 = sand.u32 (!%p192_p9), 1, %s1019_s19  }
   0xe   : > { %195 = sbr.rel (%p192_p9) target bundleno = 467 (0x1d3), region = 40  ;;  %p220_p10 = scmp.lt.s32.totalorder (!%p192_p9), %s728_s9, 31 }
   0xf   : > { %s727_s30 = sshll.u32 (!%p192_p9), %s216_s26, 7  ;;  %s753_s10 = sshll.u32 (!%p192_p9), %s1083_s22, 11 }
  0x10   : > { %s1238_s14 = scalar_lea.hbm (!%p192_p9), %s1291_s5, %s753_s10  ;;  %s1246_s22 = scalar_lea.sflag (!%p192_p9), [#allocation3], %s216_s26 }
  0x11   : > { %s1029_s15 = smov (!%p192_p9), [#allocation2]  }
  0x12   : > { %s971_s16 = sshll.u32 (!%p192_p9), %s1029_s15, 4  ;;  %s972_s16 = int_to_ptr.vmem [resolvable:$false] %s971_s16 }
  0x13   : > { %v245_v0 = vld [vmem:[%s1287_s1 + $0x18] sm:$0xff]  ;;  %v244_v1 = vld [vmem:[%s1287_s1 + $0x10] sm:$0xff]  ;;  %v243_v3 = vld [vmem:[%s1287_s1 + $0x8] sm:$0xff]  ;;  %s1299_s9 = smov (!%p220_p10, %s728_s9), 31  ;;  %vm253_vm0 = vcmask 261120   ;;  %s973_s17 = scalar_lea.vmem %s972_s16, 4096 }
  0x14   : > { %806 = vmatprep.subr.mxu0 %v245_v0  ;;  %v478_v2 = vld [vmem:[%s1289_s3 + $0x78] sm:$0xff]  ;;  %v477_v4 = vld [vmem:[%s1289_s3 + $0x70] sm:$0xff]  ;;  %v242_v5 = vld [vmem:[%s1287_s1] sm:$0xff]  ;;  %s729_s23 = sshll.u32 %s1299_s9, 3  ;;  %s1217_s9 = scalar_lea.vmem [#allocation2], %s727_s30 }
  0x15   : > { %807 = vmatpush3.msra.mxu0 %v245_v0  ;;  %894 = vmatprep.subr.mxu1 %v478_v2  ;;  %v476_v6 = vld [vmem:[%s1289_s3 + $0x68] sm:$0xff]  ;;  %s1135_s7 = scalar_lea.vmem %s1286_s0, %s729_s23  ;;  %v475_v11 = vld [vmem:[%s1289_s3 + $0x60] sm:$0xff]  ;;  %v474_v14 = vld [vmem:[%s1289_s3 + $0x58] sm:$0xff]  ;;  %s661_s11 = sshll.u32 %s1217_s9, 4  ;;  %s1240_s11 = int_to_ptr.vmem [resolvable:$true] %s661_s11 }
  0x16   : > { %808 = vmatprep.subr.mxu0 %v244_v1  ;;  %910 = vmatpush3.msra.mxu1 %v478_v2  ;;  %v226_v7 = vld [vmem:[%s1135_s7] sm:$0xff]  ;;  %v227_v8 = vld [vmem:[%s1135_s7 + $0x8] sm:$0xff]  ;;  %v228_v9 = vld [vmem:[%s1135_s7 + $0x10] sm:$0xff]  ;;  %p974_p0 = scmp.lt.s32.totalorder %s1240_s11, %s972_s16 }
  0x17   : > { %809 = vmatpush3.msra.mxu0 %v244_v1  ;;  %895 = vmatprep.subr.mxu1 %v477_v4  ;;  %v229_v10 = vld [vmem:[%s1135_s7 + $0x18] sm:$0xff]  ;;  %v230_v12 = vld [vmem:[%s1135_s7 + $0x20] sm:$0xff]  ;;  %v231_v13 = vld [vmem:[%s1135_s7 + $0x28] sm:$0xff] }
  0x18   : > { %810 = vmatprep.subr.mxu0 %v243_v3  ;;  %911 = vmatpush3.msra.mxu1 %v477_v4  ;;  %v232_v15 = vld [vmem:[%s1135_s7 + $0x30] sm:$0xff]  ;;  %v233_v17 = vld [vmem:[%s1135_s7 + $0x38] sm:$0xff]  ;;  %v472_v18 = vld [vmem:[%s1289_s3 + $0x48] sm:$0xff] }
  0x19   : > { %811 = vmatpush3.msra.mxu0 %v243_v3  ;;  %896 = vmatprep.subr.mxu1 %v476_v6  ;;  %v473_v16 = vld [vmem:[%s1289_s3 + $0x50] sm:$0xff]  ;;  %v234_v19 = vld [vmem:[%s1135_s7 + $0x40] sm:$0xff]  ;;  %v235_v21 = vld [vmem:[%s1135_s7 + $0x48] sm:$0xff] }
  0x1a   : > { %812 = vmatprep.subr.mxu0 %v242_v5  ;;  %912 = vmatpush3.msra.mxu1 %v476_v6  ;;  %v471_v20 = vld [vmem:[%s1289_s3 + $0x40] sm:$0xff]  ;;  %v470_v22 = vld [vmem:[%s1289_s3 + $0x38] sm:$0xff]  ;;  %v236_v23 = vld [vmem:[%s1135_s7 + $0x50] sm:$0xff] }
  0x1b   : > { %813 = vmatpush3.msra.mxu0 %v242_v5  ;;  %814 = vmatprep.mubr.msk.f32.mxu0 %vm253_vm0, %v226_v7  ;;  %v469_v24 = vld [vmem:[%s1289_s3 + $0x30] sm:$0xff]  ;;  %v237_v25 = vld [vmem:[%s1135_s7 + $0x58] sm:$0xff]  ;;  %v468_v26 = vld [vmem:[%s1289_s3 + $0x28] sm:$0xff] }
  0x1c   : > { %815 = vmatmul.mubr.msk.f32.vlgmr.msra.gmra.mxu0 %vm253_vm0, %v227_v8  ;;  %838 = vmatprep.subr.mxu0 %v478_v2  ;;  %v238_v27 = vld [vmem:[%s1135_s7 + $0x60] sm:$0xff]  ;;  %v239_v29 = vld [vmem:[%s1135_s7 + $0x68] sm:$0xff]  ;;  %v240_v30 = vld [vmem:[%s1135_s7 + $0x70] sm:$0xff] }
  0x1d   : > { %817 = vmatprep.mubr.msk.f32.mxu0 %vm253_vm0, %v228_v9  ;;  %839 = vmatpush3.msra.mxu0 %v478_v2  ;;  %v467_v28 = vld [vmem:[%s1289_s3 + $0x20] sm:$0xff]  ;;  %v241_v31 = vld [vmem:[%s1135_s7 + $0x78] sm:$0xff]  ;;  %v465_v33 = vld [vmem:[%s1289_s3 + $0x10] sm:$0xff]  ;;  %s967_s7 = scalar_lea.vmem %s1240_s11, 2048 }
  0x1e   : > { %840 = vmatprep.subr.mxu0 %v477_v4  ;;  %897 = vmatprep.subr.mxu1 %v475_v11  ;;  %v466_v32 = vld [vmem:[%s1289_s3 + $0x18] sm:$0xff]  ;;  %v464_v34 = vld [vmem:[%s1289_s3 + $0x8] sm:$0xff]  ;;  %v463_v35 = vld [vmem:[%s1289_s3] sm:$0xff]  ;;  %p968_p11 = scmp.ne.s32.totalorder %s1240_s11, %s967_s7  ;;  %p975_p1 = scmp.lt.s32.totalorder %s973_s17, %s967_s7 }
  0x1f   : > { %841 = vmatpush3.msra.mxu0 %v477_v4  ;;  %913 = vmatpush3.msra.mxu1 %v475_v11  ;;  %v730_v36 = vld [vmem:[%s1288_s2] ss:$0 sm:$0xff] }
  0x20   : > { %818 = vmatmul.mubr.msk.f32.gmra.mxu0 %vm253_vm0, %v229_v10  ;;  %842 = vmatprep.subr.mxu0 %v476_v6  ;;  %p969_p12 = pnand %p968_p11, %p1100_p5  ;;  %p976_p2 = por %p975_p1, %p974_p0 }
  0x21   : > { %820 = vmatprep.mubr.msk.f32.mxu0 %vm253_vm0, %v230_v12  ;;  %843 = vmatpush3.msra.mxu0 %v476_v6 }
  0x22   : > { %844 = vmatprep.subr.mxu0 %v475_v11  ;;  %898 = vmatprep.subr.mxu1 %v474_v14  ;;  %p970_p13 = pneg %p969_p12 }
  0x23   : > { %845 = vmatpush3.msra.mxu0 %v475_v11  ;;  %914 = vmatpush3.msra.mxu1 %v474_v14 }
  0x24   : > { %821 = vmatmul.mubr.msk.f32.gmra.mxu0 %vm253_vm0, %v231_v13  ;;  %846 = vmatprep.subr.mxu0 %v474_v14  ;;  %p977_p3 = pnand %p976_p2, %p970_p13 }
  0x25   : > { %823 = vmatprep.mubr.msk.f32.mxu0 %vm253_vm0, %v232_v15  ;;  %847 = vmatpush3.msra.mxu0 %v474_v14 }
  0x26   : > { %848 = vmatprep.subr.mxu0 %v473_v16  ;;  %899 = vmatprep.subr.mxu1 %v473_v16 }
  0x27   : > { %849 = vmatpush3.msra.mxu0 %v473_v16  ;;  %915 = vmatpush3.msra.mxu1 %v473_v16 }
  0x28   : > { %824 = vmatmul.mubr.msk.f32.gmra.mxu0 %vm253_vm0, %v233_v17  ;;  %850 = vmatprep.subr.mxu0 %v472_v18 }
  0x29   : > { %826 = vmatprep.mubr.msk.f32.mxu0 %vm253_vm0, %v234_v19  ;;  %851 = vmatpush3.msra.mxu0 %v472_v18 }
  0x2a   : > { %852 = vmatprep.subr.mxu0 %v471_v20  ;;  %900 = vmatprep.subr.mxu1 %v472_v18 }
  0x2b   : > { %853 = vmatpush3.msra.mxu0 %v471_v20  ;;  %916 = vmatpush3.msra.mxu1 %v472_v18 }
  0x2c   : > { %827 = vmatmul.mubr.msk.f32.gmra.mxu0 %vm253_vm0, %v235_v21  ;;  %854 = vmatprep.subr.mxu0 %v470_v22  ;;  %v747_v21 = vld [vmem:[%s1290_s4] ss:$0 sm:$0xff] }
  0x2d   : > { %829 = vmatprep.mubr.msk.f32.mxu0 %vm253_vm0, %v236_v23  ;;  %855 = vmatpush3.msra.mxu0 %v470_v22 }
  0x2e   : > { %856 = vmatprep.subr.mxu0 %v469_v24  ;;  %901 = vmatprep.subr.mxu1 %v471_v20 }
  0x2f   : > { %857 = vmatpush3.msra.mxu0 %v469_v24  ;;  %917 = vmatpush3.msra.mxu1 %v471_v20 }
  0x30   : > { %830 = vmatmul.mubr.msk.f32.gmra.mxu0 %vm253_vm0, %v237_v25  ;;  %858 = vmatprep.subr.mxu0 %v468_v26 }
  0x31   : > { %832 = vmatprep.mubr.msk.f32.mxu0 %vm253_vm0, %v238_v27  ;;  %859 = vmatpush3.msra.mxu0 %v468_v26 }
  0x32   : > { %860 = vmatprep.subr.mxu0 %v467_v28  ;;  %902 = vmatprep.subr.mxu1 %v470_v22 }
  0x33   : > { %861 = vmatpush3.msra.mxu0 %v467_v28  ;;  %918 = vmatpush3.msra.mxu1 %v470_v22 }
  0x34   : > { %833 = vmatmul.mubr.msk.f32.gmra.mxu0 %vm253_vm0, %v239_v29  ;;  %903 = vmatprep.subr.mxu1 %v469_v24 }
  0x35   : > { %835 = vmatprep.mubr.msk.f32.mxu0 %vm253_vm0, %v240_v30  ;;  %919 = vmatpush3.msra.mxu1 %v469_v24 }
  0x36   : > { %904 = vmatprep.subr.mxu1 %v468_v26  ;;  %862 = vmatprep.subr.mxu0 %v466_v32 }
  0x37   : > { %920 = vmatpush3.msra.mxu1 %v468_v26  ;;  %863 = vmatpush3.msra.mxu0 %v466_v32 }
  0x38   : > { %836 = vmatmul.mubr.msk.f32.gmra.mxu0 %vm253_vm0, %v241_v31  ;;  %905 = vmatprep.subr.mxu1 %v467_v28 }
  0x39   : > { %921 = vmatpush3.msra.mxu1 %v467_v28  ;;  %864 = vmatprep.subr.mxu0 %v465_v33 }
  0x3a   : > { %906 = vmatprep.subr.mxu1 %v466_v32  ;;  %865 = vmatpush3.msra.mxu0 %v465_v33 }
  0x3b   : > { %922 = vmatpush3.msra.mxu1 %v466_v32  ;;  %866 = vmatprep.subr.mxu0 %v464_v34 }
  0x3c   : > { %907 = vmatprep.subr.mxu1 %v465_v33  ;;  %867 = vmatpush3.msra.mxu0 %v464_v34 }
  0x3d   : > { %923 = vmatpush3.msra.mxu1 %v465_v33  ;;  %868 = vmatprep.subr.mxu0 %v463_v35 }
  0x3e   : > { %908 = vmatprep.subr.mxu1 %v464_v34  ;;  %869 = vmatpush3.msra.mxu0 %v463_v35 }
  0x3f   : > { %924 = vmatpush3.msra.mxu1 %v464_v34 }
  0x40   : > { %909 = vmatprep.subr.mxu1 %v463_v35 }
  0x41   : > { %925 = vmatpush3.msra.mxu1 %v463_v35 }
  0xdc   : > { %v816_v37 = vpop.f32.mrf.mxu0 }
  0xdd   : > { %v374_v38 = vadd.f32 %v816_v37, %v730_v36 }
  0xde   : > { %v368_v39 = vpop.f32.mrf.mxu0 }
  0xdf   : > { %v369_v40 = vadd.f32 %v730_v36, %v368_v39  ;;  %v448_v43 = vmax.f32 %v374_v38, 0.0 }
  0xe0   : > { %v819_v41 = vpop.f32.mrf.mxu0 }
  0xe1   : > { %v447_v42 = vmax.f32 %v369_v40, 0.0  ;;  %v384_v44 = vadd.f32 %v819_v41, %v730_v36 }
  0xe2   : > { %v378_v45 = vpop.f32.mrf.mxu0 }
  0xe3   : > { %v379_v46 = vadd.f32 %v730_v36, %v378_v45  ;;  %870 = vmatprep.mubr.f32.mxu0 %v447_v42  ;;  %v450_v49 = vmax.f32 %v384_v44, 0.0 }
  0xe4   : > { %v822_v47 = vpop.f32.mrf.mxu0  ;;  %871 = vmatmul.mubr.f32.vlgmr.msra.gmra.mxu0 %v448_v43 }
  0xe5   : > { %v449_v48 = vmax.f32 %v379_v46, 0.0  ;;  %v394_v50 = vadd.f32 %v822_v47, %v730_v36 }
  0xe6   : > { %v388_v51 = vpop.f32.mrf.mxu0 }
  0xe7   : > { %v389_v52 = vadd.f32 %v730_v36, %v388_v51  ;;  %873 = vmatprep.mubr.f32.mxu0 %v449_v48  ;;  %v452_v55 = vmax.f32 %v394_v50, 0.0 }
  0xe8   : > { %v825_v53 = vpop.f32.mrf.mxu0  ;;  %874 = vmatmul.mubr.f32.gmra.mxu0 %v450_v49 }
  0xe9   : > { %v451_v54 = vmax.f32 %v389_v52, 0.0  ;;  %v404_v56 = vadd.f32 %v825_v53, %v730_v36 }
  0xea   : > { %v398_v57 = vpop.f32.mrf.mxu0 }
  0xeb   : > { %876 = vmatprep.mubr.f32.mxu0 %v451_v54  ;;  %v399_v58 = vadd.f32 %v730_v36, %v398_v57  ;;  %v454_v61 = vmax.f32 %v404_v56, 0.0 }
  0xec   : > { %v828_v59 = vpop.f32.mrf.mxu0  ;;  %877 = vmatmul.mubr.f32.gmra.mxu0 %v452_v55 }
  0xed   : > { %v453_v60 = vmax.f32 %v399_v58, 0.0  ;;  %v414_v62 = vadd.f32 %v828_v59, %v730_v36 }
  0xee   : > { %v408_v63 = vpop.f32.mrf.mxu0 }
  0xef   : > { %v409_v0 = vadd.f32 %v730_v36, %v408_v63  ;;  %879 = vmatprep.mubr.f32.mxu1 %v453_v60  ;;  %v456_v3 = vmax.f32 %v414_v62, 0.0 }
  0xf0   : > { %v831_v1 = vpop.f32.mrf.mxu0  ;;  %880 = vmatmul.mubr.f32.vlgmr.msra.gmra.mxu1 %v454_v61 }
  0xf1   : > { %v455_v2 = vmax.f32 %v409_v0, 0.0  ;;  %v424_v4 = vadd.f32 %v831_v1, %v730_v36 }
  0xf2   : > { %v418_v5 = vpop.f32.mrf.mxu0 }
  0xf3   : > { %v419_v6 = vadd.f32 %v730_v36, %v418_v5  ;;  %882 = vmatprep.mubr.f32.mxu1 %v455_v2  ;;  %v458_v9 = vmax.f32 %v424_v4, 0.0 }
  0xf4   : > { %v834_v7 = vpop.f32.mrf.mxu0  ;;  %883 = vmatmul.mubr.f32.gmra.mxu1 %v456_v3 }
  0xf5   : > { %v457_v8 = vmax.f32 %v419_v6, 0.0  ;;  %v434_v10 = vadd.f32 %v834_v7, %v730_v36 }
  0xf6   : > { %v428_v11 = vpop.f32.mrf.mxu0 }
  0xf7   : > { %v429_v12 = vadd.f32 %v730_v36, %v428_v11  ;;  %885 = vmatprep.mubr.f32.mxu1 %v457_v8  ;;  %v460_v15 = vmax.f32 %v434_v10, 0.0 }
  0xf8   : > { %v837_v13 = vpop.f32.mrf.mxu0  ;;  %886 = vmatmul.mubr.f32.gmra.mxu1 %v458_v9 }
  0xf9   : > { %v459_v14 = vmax.f32 %v429_v12, 0.0  ;;  %v444_v16 = vadd.f32 %v837_v13, %v730_v36 }
  0xfa   : > { %v438_v17 = vpop.f32.mrf.mxu0 }
  0xfb   : > { %v439_v18 = vadd.f32 %v730_v36, %v438_v17  ;;  %888 = vmatprep.mubr.f32.mxu1 %v459_v14  ;;  %v462_v20 = vmax.f32 %v444_v16, 0.0 }
  0xfc   : > { %889 = vmatmul.mubr.f32.gmra.mxu1 %v460_v15 }
  0xfd   : > { %v461_v19 = vmax.f32 %v439_v18, 0.0 }
  0xff   : > { %891 = vmatprep.mubr.f32.mxu1 %v461_v19 }
 0x100   : > { %892 = vmatmul.mubr.f32.gmra.mxu1 %v462_v20 }
 0x1a4   : > { %v872_v22 = vpop.f32.mrf.mxu0 }
 0x1a5   : > { %v558_v23 = vadd.f32 %v872_v22, %v747_v21 }
 0x1a6   : > { %v552_v24 = vpop.f32.mrf.mxu0 }
 0x1a7   : > { %632 = vst [vmem:[%s1217_s9 + $0x8] sm:$0xff] %v558_v23  ;;  %v553_v25 = vadd.f32 %v747_v21, %v552_v24 }
 0x1a8   : > { %v875_v26 = vpop.f32.mrf.mxu0 }
 0x1a9   : > { %631 = vst [vmem:[%s1217_s9] sm:$0xff] %v553_v25  ;;  %v568_v27 = vadd.f32 %v875_v26, %v747_v21 }
 0x1aa   : > { %v562_v28 = vpop.f32.mrf.mxu0 }
 0x1ab   : > { %634 = vst [vmem:[%s1217_s9 + $0x18] sm:$0xff] %v568_v27  ;;  %v563_v29 = vadd.f32 %v747_v21, %v562_v28 }
 0x1ac   : > { %v878_v30 = vpop.f32.mrf.mxu0 }
 0x1ad   : > { %633 = vst [vmem:[%s1217_s9 + $0x10] sm:$0xff] %v563_v29  ;;  %v578_v31 = vadd.f32 %v878_v30, %v747_v21 }
 0x1ae   : > { %v572_v32 = vpop.f32.mrf.mxu0 }
 0x1af   : > { %636 = vst [vmem:[%s1217_s9 + $0x28] sm:$0xff] %v578_v31  ;;  %v573_v33 = vadd.f32 %v747_v21, %v572_v32 }
 0x1b0   : > { %v881_v34 = vpop.f32.mrf.mxu1 }
 0x1b1   : > { %635 = vst [vmem:[%s1217_s9 + $0x20] sm:$0xff] %v573_v33  ;;  %v588_v35 = vadd.f32 %v881_v34, %v747_v21 }
 0x1b2   : > { %v582_v36 = vpop.f32.mrf.mxu1 }
 0x1b3   : > { %638 = vst [vmem:[%s1217_s9 + $0x38] sm:$0xff] %v588_v35  ;;  %v583_v37 = vadd.f32 %v747_v21, %v582_v36 }
 0x1b4   : > { %v884_v38 = vpop.f32.mrf.mxu1 }
 0x1b5   : > { %637 = vst [vmem:[%s1217_s9 + $0x30] sm:$0xff] %v583_v37  ;;  %v598_v39 = vadd.f32 %v884_v38, %v747_v21 }
 0x1b6   : > { %v592_v40 = vpop.f32.mrf.mxu1 }
 0x1b7   : > { %640 = vst [vmem:[%s1217_s9 + $0x48] sm:$0xff] %v598_v39  ;;  %v593_v41 = vadd.f32 %v747_v21, %v592_v40 }
 0x1b8   : > { %v887_v42 = vpop.f32.mrf.mxu1 }
 0x1b9   : > { %639 = vst [vmem:[%s1217_s9 + $0x40] sm:$0xff] %v593_v41  ;;  %v608_v43 = vadd.f32 %v887_v42, %v747_v21 }
 0x1ba   : > { %v602_v44 = vpop.f32.mrf.mxu1 }
 0x1bb   : > { %642 = vst [vmem:[%s1217_s9 + $0x58] sm:$0xff] %v608_v43  ;;  %v603_v45 = vadd.f32 %v747_v21, %v602_v44 }
 0x1bc   : > { %v890_v46 = vpop.f32.mrf.mxu1 }
 0x1bd   : > { %641 = vst [vmem:[%s1217_s9 + $0x50] sm:$0xff] %v603_v45  ;;  %v618_v47 = vadd.f32 %v890_v46, %v747_v21 }
 0x1be   : > { %v612_v48 = vpop.f32.mrf.mxu1 }
 0x1bf   : > { %644 = vst [vmem:[%s1217_s9 + $0x68] sm:$0xff] %v618_v47  ;;  %v613_v49 = vadd.f32 %v747_v21, %v612_v48 }
 0x1c0   : > { %v893_v50 = vpop.f32.mrf.mxu1 }
 0x1c1   : > { %643 = vst [vmem:[%s1217_s9 + $0x60] sm:$0xff] %v613_v49  ;;  %v628_v51 = vadd.f32 %v893_v50, %v747_v21 }
 0x1c2   : > { %v622_v52 = vpop.f32.mrf.mxu1 }
 0x1c3   : > { %646 = vst [vmem:[%s1217_s9 + $0x78] sm:$0xff] %v628_v51  ;;  %v623_v53 = vadd.f32 %v747_v21, %v622_v52 }
 0x1c5   : > { %645 = vst [vmem:[%s1217_s9 + $0x70] sm:$0xff] %v623_v53 }
 0x1c6   : > { %980 = shalt.err (!%p977_p3)
}
 0x1c7   : > { %s981_s23 = scalar_lea.hbm %s1238_s14, 2048  ;;  %s985_s30 = scalar_lea.hbm %s1291_s5, 4096 }
 0x1c8   : > { %p982_p4 = scmp.ne.s32.totalorder %s1238_s14, %s981_s23  ;;  %p986_p9 = scmp.lt.s32.totalorder %s1238_s14, %s1291_s5 }
 0x1c9   : > { %p987_p10 = scmp.lt.s32.totalorder %s985_s30, %s981_s23 }
 0x1ca   : > { %p983_p7 = pnand %p982_p4, %p1100_p5 }
 0x1cb   : > { %p988_p11 = por %p987_p10, %p986_p9 }
 0x1cc   : > { %p984_p8 = pneg %p983_p7 }
 0x1ce   : > { %p989_p12 = pnand %p988_p11, %p984_p8 }
 0x1d0   : > { %992 = shalt.err (!%p989_p12)
}
 0x1d1   : > { %s1030_s9 = smov 128   ;;  %s1031_s10 = smov 8  }
 0x1d2   : > { %926 = dma.vmem_to_hbm [thread:$0]  (%p1100_p5), %s1240_s11, 2048, %s1238_s14, %s1246_s22, %s1030_s9, %s1030_s9, %s1031_s10  }
 0x1d3 PF: > { %p932_p13 = scmp.ge.s32.totalorder %s1027_s21, 2  ;;  %s676_s12 = sand.u32 1, %s1015_s18  }
 0x1d4   : > { %s677_s13 = scalar_lea.sflag [#allocation3], %s676_s12 }
 0x1d5   : > { %p929_p0 = pnand %p932_p13, %p1104_p6 }
 0x1d7   : > { %p930_p1 = pneg %p929_p0 }
 0x1d9   : > { %1010 = dma.done.wait (%p930_p1), %s677_s13, 2048  }
 0x1da   : > { %1012 = vsyncadd (%p930_p1), %s677_s13, 4294965248  ;;  %p15_p2 = scmp.ge.s32.totalorder %s1087_s24, 4   ;;  %s1294_s18 = smov %s1019_s19 }
 0x1db   : > { %s1295_s19 = smov %s1023_s20  ;;  %s1296_s20 = smov %s1098_s27 }
 0x1dc   : > { %s1297_s21 = smov %s1087_s24  ;;  %17 = sbr.rel (!%p15_p2) target bundleno = 3 (0x3), region = 75 }
 0x1e1   :  { %682 = vsyncpa [#allocation3], 1 }
 0x1e2   :  { %684 = vsyncpa [#allocation3 + $0x1], 1 }

</bundles_post_ra>
